<compile_context>
chip_gen: v7x
topology: tpu7x:2x2x1
jax: 0.10.0
libtpu: 0.0.40
codegen_flags: <defaults>
</compile_context>

<pallas_src>
import math

import jax
import jax.numpy as jnp
from jax import lax
from jax.experimental import pallas as pl
from jax.experimental.pallas import tpu as pltpu

# ---- module-consistent small sizes --------------------------------------------------
B = 2        # batch
N = 8        # entities (nodes) per batch
BN = B * N   # stacked nodes (block-diagonal graph)
F_IN = 12    # input_entities_size
E_EMB = 32   # edge_selector_emb_size
D = 32       # mha_emb_size (GAT feature size)
HS = 2       # edge_selector_num_head
HG = 2       # mha_num_head (GAT heads)
TAU = 1.0
LRELU = 0.2       # GAT LeakyReLU slope
NEG_MASK = -1e30  # edge-selector visibility mask value (log space)
NEG_GAT = -1e9    # GAT adjacency mask value

# ---- packed WEIGHT slab layout: (SLAB_ROWS, 256) f32, every slice lane-0 aligned ----
SLAB_COLS = 256
R_EMB = 0                    # [R_EMB : R_EMB+F_IN, 0:E_EMB]          w_emb
R_BEMB = F_IN                # [R_BEMB, 0:E_EMB]                       b_emb
R_QKV = 16                   # [R_QKV : R_QKV+E_EMB, 0:QKV_COLS]       [wq0|wq1|wk0|wk1|wv]
QKV_COLS = 2 * HS * D + D    # 160
R_G = 48                     # [R_G : R_G+D, 0:G_COLS]    [wg0|wg1| wg0@a_src0 | wg1@a_src1]
G_COLS = HG * D + HG         # 66
R_ADST = 80                  # [R_ADST : R_ADST+HG, 0:D]               a_dst rows
SLAB_ROWS = 88               # padded to a multiple of 8 sublanes

# ---- packed ACTIVATION slab layout: (BN, 128) f32 -----------------------------------
ACT_COLS = 128
C_X = 0                      # [:, 0:F_IN]        input features (BN, F_IN)
C_VMUL = 16                  # [:, 16:32]         block-diag 0/1 visibility (BN, BN)
C_VADD = 32                  # [:, 32:48]         block-diag additive log-mask 0/-1e30
C_GUM = 48                   # [:, 48+h*BN : ...] gumbel noise per edge-selector head


def _softmax_last(x):
    m = jnp.max(x, axis=-1, keepdims=True)
    e = jnp.exp(x - m)
    return e * pl.reciprocal(jnp.sum(e, axis=-1, keepdims=True), approx=True)


def lc_kernel(scal_ref, id_ref, act_ref, w_ref, out_ref, nodes_ref):
    w_lin = scal_ref[0]      # nn.Linear(1,1).weight
    # scal_ref[1] is b_lin: a constant per-row shift is a no-op under the softmax.
    inv_tau = scal_ref[2]

    x = act_ref[:, C_X:C_X + F_IN]                         # (BN, F_IN)
    vis_mul = act_ref[:, C_VMUL:C_VMUL + BN]               # (BN, BN) 0/1
    vis_add = act_ref[:, C_VADD:C_VADD + BN]               # (BN, BN) 0/-1e30

    # --- edge_selector: shared embedding + fused Q/K/V projection (one MXU pass) -----
    w_emb = w_ref[R_EMB:R_EMB + F_IN, 0:E_EMB]             # (F_IN, E_EMB)
    b_emb = w_ref[R_BEMB:R_BEMB + 1, 0:E_EMB]              # (1, E_EMB)
    emb = jnp.maximum(
        jnp.dot(x, w_emb, preferred_element_type=jnp.float32) + b_emb, 0.0)   # (BN, E)

    qkv = jnp.dot(emb, w_ref[R_QKV:R_QKV + E_EMB, 0:QKV_COLS],
                  preferred_element_type=jnp.float32)      # (BN, 160)
    clustered = qkv[:, 2 * HS * D:2 * HS * D + D]          # (BN, D)  (the wv columns)

    scale = 1.0 / math.sqrt(D)
    adj = jnp.zeros((BN, BN), jnp.float32)
    for h in range(HS):
        q = qkv[:, h * D:(h + 1) * D]                                  # (BN, D)
        k = qkv[:, HS * D + h * D:HS * D + (h + 1) * D]                # (BN, D)
        s = lax.dot_general(q, k, (((1,), (1,)), ((), ())),
                            preferred_element_type=jnp.float32) * scale  # (BN, BN)
        # softmax(A) * vis / sum(...)  ==  masked softmax of A; additive log-mask form.
        a = s * w_lin + vis_add
        a_max = jnp.max(a, axis=-1, keepdims=True)
        lse = a_max + jnp.log(jnp.sum(jnp.exp(a - a_max), axis=-1, keepdims=True))
        log_em = a - lse                                   # log(edge_multinomial)
        gum = act_ref[:, C_GUM + h * BN:C_GUM + (h + 1) * BN]
        # relaxed Gumbel-softmax edge sampling (hard=False), accumulated over heads
        adj = adj + _softmax_last((log_em + gum) * inv_tau)
    adj = adj * vis_mul                                    # sampled_edges.sum(1) * vis

    # --- single GAT layer: HG heads, additive attention, masked softmax, head mean ---
    # TODO(synk): GAT dropout(0.25) is train-time stochastic; omitted (eval semantics).
    # The GAT consumes `adj` only as connectivity (> 0), per the reference GAT impl.
    gproj = jnp.dot(clustered, w_ref[R_G:R_G + D, 0:G_COLS],
                    preferred_element_type=jnp.float32)    # (BN, 66): feats + e_src cols
    acc = jnp.zeros((BN, D), jnp.float32)
    for hd in range(HG):
        hfeat = gproj[:, hd * D:(hd + 1) * D]                          # (BN, D)
        e_src = gproj[:, HG * D + hd:HG * D + hd + 1]                  # (BN, 1) folded col
        a_dst = w_ref[R_ADST + hd:R_ADST + hd + 1, 0:D]                # (1, D)
        e_dst = lax.dot_general(a_dst, hfeat, (((1,), (1,)), ((), ())),
                                preferred_element_type=jnp.float32)    # (1, BN)
        e = e_src + e_dst
        e = jnp.where(e > 0.0, e, LRELU * e)               # LeakyReLU(0.2)
        e = jnp.where(adj > 0.0, e, NEG_GAT)               # mask non-edges
        attn = _softmax_last(e)
        acc = acc + jnp.dot(attn, hfeat, preferred_element_type=jnp.float32)
    nodes_ref[...] = acc * (1.0 / HG)                      # (BN, D)

    # --- robot-node gather: hidden_b = nodes[b*N + ((N - id_b) % N)] ------------------
    for b in range(B):
        g = b * N + (N - id_ref[b]) % N          # PyTorch negative-indexing semantics
        out_ref[pl.ds(b, 1), :] = nodes_ref[pl.ds(g, 1), :]


@jax.jit
def lc_forward(x, visibility, gumbel, slab, scalars, id_robot):
    # ---- pack all per-call activations into ONE lane-dense (BN, 128) slab -----------
    x2 = x.reshape(BN, F_IN)
    vis_blk = jnp.zeros((BN, BN), jnp.float32)
    for b in range(B):
        vis_blk = vis_blk.at[b * N:(b + 1) * N, b * N:(b + 1) * N].set(visibility[b])
    vis_add = jnp.where(vis_blk > 0.0, 0.0, NEG_MASK).astype(jnp.float32)

    act = jnp.zeros((BN, ACT_COLS), jnp.float32)
    act = act.at[:, C_X:C_X + F_IN].set(x2)
    act = act.at[:, C_VMUL:C_VMUL + BN].set(vis_blk)
    act = act.at[:, C_VADD:C_VADD + BN].set(vis_add)
    for h in range(HS):
        act = act.at[:, C_GUM + h * BN:C_GUM + (h + 1) * BN].set(gumbel[h])

    return pl.pallas_call(
        lc_kernel,
        out_shape=jax.ShapeDtypeStruct((B, D), jnp.float32),
        in_specs=[
            pl.BlockSpec(memory_space=pltpu.MemorySpace.SMEM),   # scalars (3,)
            pl.BlockSpec(memory_space=pltpu.MemorySpace.SMEM),   # id_robot (B,) int32
            pl.BlockSpec(memory_space=pltpu.MemorySpace.VMEM),   # activation slab
            pl.BlockSpec(memory_space=pltpu.MemorySpace.VMEM),   # weight slab
        ],
        out_specs=pl.BlockSpec(memory_space=pltpu.MemorySpace.VMEM),
        scratch_shapes=[pltpu.VMEM((BN, D), jnp.float32)],       # node features
    )(scalars, id_robot, act, slab)


# ---- host-side setup: parameters, packed weight slab, scalar bundle -----------------
def make_params(key):
    ks = jax.random.split(key, 9)
    return {
        "w_emb": jax.random.normal(ks[0], (F_IN, E_EMB), jnp.float32) / math.sqrt(F_IN),
        "b_emb": jnp.zeros((1, E_EMB), jnp.float32),
        "wq": jax.random.normal(ks[1], (HS, E_EMB, D), jnp.float32) / math.sqrt(E_EMB),
        "wk": jax.random.normal(ks[2], (HS, E_EMB, D), jnp.float32) / math.sqrt(E_EMB),
        "wv": jax.random.normal(ks[3], (E_EMB, D), jnp.float32) / math.sqrt(E_EMB),
        "w_gat": jax.random.normal(ks[4], (HG, D, D), jnp.float32) / math.sqrt(D),
        "a_src": jax.random.normal(ks[5], (HG, D, 1), jnp.float32) / math.sqrt(D),
        "a_dst": jax.random.normal(ks[6], (HG, 1, D), jnp.float32) / math.sqrt(D),
        "w_lin": jax.random.normal(ks[7], ()) * 0.5 + 1.0,   # nn.Linear(1,1) weight
        "b_lin": jax.random.normal(ks[8], ()) * 0.1,          # nn.Linear(1,1) bias
    }


def pack_params(params):
    """Pack every weight into one lane-dense (SLAB_ROWS, 256) f32 slab (single DMA)."""
    slab = jnp.zeros((SLAB_ROWS, SLAB_COLS), jnp.float32)
    slab = slab.at[R_EMB:R_EMB + F_IN, 0:E_EMB].set(params["w_emb"])
    slab = slab.at[R_BEMB:R_BEMB + 1, 0:E_EMB].set(params["b_emb"])
    # fused Q/K/V RHS: [wq0 | wq1 | wk0 | wk1 | wv]  -> (E_EMB, 160)
    wqkv = jnp.concatenate([params["wq"][h] for h in range(HS)]
                           + [params["wk"][h] for h in range(HS)]
                           + [params["wv"]], axis=1)
    slab = slab.at[R_QKV:R_QKV + E_EMB, 0:QKV_COLS].set(wqkv)
    # GAT RHS: [wg0 | wg1 | wg0 @ a_src0 | wg1 @ a_src1]  -> (D, 66)
    wg = jnp.concatenate([params["w_gat"][h] for h in range(HG)]
                         + [params["w_gat"][h] @ params["a_src"][h] for h in range(HG)],
                         axis=1)
    slab = slab.at[R_G:R_G + D, 0:G_COLS].set(wg)
    slab = slab.at[R_ADST:R_ADST + HG, 0:D].set(params["a_dst"][:, 0, :])
    return slab


def pack_scalars(params, tau=TAU):
    # [w_lin, b_lin, 1/tau] as SMEM scalars -> no Mosaic recompile if values change.
    return jnp.stack([params["w_lin"].astype(jnp.float32),
                      params["b_lin"].astype(jnp.float32),
                      jnp.float32(1.0 / tau)])


if __name__ == "__main__":
    key = jax.random.PRNGKey(0)
    k_x, k_vis, k_gum, k_par = jax.random.split(key, 4)

    x = jax.random.normal(k_x, (B, N, F_IN), jnp.float32)
    visibility = (jax.random.uniform(k_vis, (B, N, N)) > 0.3).astype(jnp.float32)
    # guarantee every node sees itself so no row is fully masked (precondition above)
    visibility = jnp.maximum(visibility, jnp.eye(N, dtype=jnp.float32)[None])
    # deterministic Gumbel noise for the relaxed edge sampler (only the block-diagonal
    # entries of each (BN, BN) slice meaningfully affect the result)
    gumbel = jax.random.gumbel(k_gum, (HS, BN, BN), jnp.float32)
    id_robot = jnp.array([1, 2], dtype=jnp.int32)

    params = make_params(k_par)
    slab = pack_params(params)          # one-time host/setup packing
    scalars = pack_scalars(params, tau=TAU)

    out = lc_forward(x, visibility, gumbel, slab, scalars, id_robot)
    out = jax.block_until_ready(out)
    assert out.shape == (B, D)
    assert bool(jnp.all(jnp.isfinite(out)))
    print("KERNEL_OK")
</pallas_src>

<mosaic_0001>
module attributes {stable_mosaic.version = 11 : i64} {
  func.func @lc_kernel(%arg0: memref<3xf32, #tpu.memory_space<smem>>, %arg1: memref<2xi32, #tpu.memory_space<smem>>, %arg2: memref<16x128xf32, #tpu.memory_space<vmem>>, %arg3: memref<88x256xf32, #tpu.memory_space<vmem>>, %arg4: memref<2x32xf32, #tpu.memory_space<vmem>>, %arg5: memref<16x32xf32, #tpu.memory_space<vmem>>) attributes {dimension_semantics = [], scalar_prefetch = 0 : i64, scratch_operands = 1 : i64, tpu.core_type = #tpu.core_type<tc>} {
    %c0 = arith.constant 0 : index
    %0 = memref.load %arg0[%c0] : memref<3xf32, #tpu.memory_space<smem>>
    %c2 = arith.constant 2 : index
    %1 = memref.load %arg0[%c2] : memref<3xf32, #tpu.memory_space<smem>>
    %c0_0 = arith.constant 0 : index
    %c0_1 = arith.constant 0 : index
    %2 = vector.load %arg2[%c0_0, %c0_1] : memref<16x128xf32, #tpu.memory_space<vmem>>, vector<16x12xf32>
    %c0_2 = arith.constant 0 : index
    %c16 = arith.constant 16 : index
    %3 = vector.load %arg2[%c0_2, %c16] : memref<16x128xf32, #tpu.memory_space<vmem>>, vector<16x16xf32>
    %c0_3 = arith.constant 0 : index
    %c32 = arith.constant 32 : index
    %4 = vector.load %arg2[%c0_3, %c32] : memref<16x128xf32, #tpu.memory_space<vmem>>, vector<16x16xf32>
    %c0_4 = arith.constant 0 : index
    %c0_5 = arith.constant 0 : index
    %5 = vector.load %arg3[%c0_4, %c0_5] : memref<88x256xf32, #tpu.memory_space<vmem>>, vector<12x32xf32>
    %c12 = arith.constant 12 : index
    %c0_6 = arith.constant 0 : index
    %6 = vector.load %arg3[%c12, %c0_6] : memref<88x256xf32, #tpu.memory_space<vmem>>, vector<1x32xf32>
    %cst = arith.constant dense<0.000000e+00> : vector<16x32xf32>
    %7 = tpu.matmul %2, %5, %cst {dimension_numbers = #tpu.dot_dimension_numbers<[1], [0], [0], [1], [0, 0, 1, 1], [], []>} : vector<16x12xf32>, vector<12x32xf32>, vector<16x32xf32> -> vector<16x32xf32>
    %8 = vector.broadcast %6 : vector<1x32xf32> to vector<16x32xf32>
    %9 = arith.addf %7, %8 : vector<16x32xf32>
    %cst_7 = arith.constant 0.000000e+00 : f32
    %10 = vector.broadcast %cst_7 : f32 to vector<16x32xf32>
    %11 = arith.maximumf %9, %10 : vector<16x32xf32>
    %c16_8 = arith.constant 16 : index
    %c0_9 = arith.constant 0 : index
    %12 = vector.load %arg3[%c16_8, %c0_9] : memref<88x256xf32, #tpu.memory_space<vmem>>, vector<32x160xf32>
    %cst_10 = arith.constant dense<0.000000e+00> : vector<16x160xf32>
    %13 = tpu.matmul %11, %12, %cst_10 {dimension_numbers = #tpu.dot_dimension_numbers<[1], [0], [0], [1], [0, 0, 1, 1], [], []>} : vector<16x32xf32>, vector<32x160xf32>, vector<16x160xf32> -> vector<16x160xf32>
    %14 = vector.extract_strided_slice %13 {offsets = [0, 128], sizes = [16, 32], strides = [1, 1]} : vector<16x160xf32> to vector<16x32xf32>
    %cst_11 = arith.constant 0.000000e+00 : f32
    %15 = vector.broadcast %cst_11 : f32 to vector<16x16xf32>
    %16 = vector.extract_strided_slice %13 {offsets = [0, 0], sizes = [16, 32], strides = [1, 1]} : vector<16x160xf32> to vector<16x32xf32>
    %17 = vector.extract_strided_slice %13 {offsets = [0, 64], sizes = [16, 32], strides = [1, 1]} : vector<16x160xf32> to vector<16x32xf32>
    %cst_12 = arith.constant dense<0.000000e+00> : vector<16x16xf32>
    %18 = tpu.matmul %16, %17, %cst_12 {dimension_numbers = #tpu.dot_dimension_numbers<[1], [1], [0], [0], [0, 0, 1, 0], [], []>} : vector<16x32xf32>, vector<16x32xf32>, vector<16x16xf32> -> vector<16x16xf32>
    %cst_13 = arith.constant 0.176776692 : f32
    %19 = vector.broadcast %cst_13 : f32 to vector<16x16xf32>
    %20 = arith.mulf %18, %19 : vector<16x16xf32>
    %21 = vector.broadcast %0 : f32 to vector<16x16xf32>
    %22 = arith.mulf %20, %21 : vector<16x16xf32>
    %23 = arith.addf %22, %4 : vector<16x16xf32>
    %cst_14 = arith.constant dense<0xFF800000> : vector<16xf32>
    %24 = vector.multi_reduction <maximumf>, %23, %cst_14 [1] : vector<16x16xf32> to vector<16xf32>
    %25 = vector.shape_cast %24 : vector<16xf32> to vector<16x1xf32>
    %26 = vector.broadcast %25 : vector<16x1xf32> to vector<16x16xf32>
    %27 = arith.subf %23, %26 : vector<16x16xf32>
    %28 = math.exp %27 : vector<16x16xf32>
    %cst_15 = arith.constant dense<0.000000e+00> : vector<16xf32>
    %29 = vector.multi_reduction <add>, %28, %cst_15 [1] : vector<16x16xf32> to vector<16xf32>
    %30 = vector.shape_cast %29 : vector<16xf32> to vector<16x1xf32>
    %31 = math.log %30 : vector<16x1xf32>
    %32 = arith.addf %25, %31 : vector<16x1xf32>
    %33 = vector.broadcast %32 : vector<16x1xf32> to vector<16x16xf32>
    %34 = arith.subf %23, %33 : vector<16x16xf32>
    %c0_16 = arith.constant 0 : index
    %c48 = arith.constant 48 : index
    %35 = vector.load %arg2[%c0_16, %c48] : memref<16x128xf32, #tpu.memory_space<vmem>>, vector<16x16xf32>
    %36 = arith.addf %34, %35 : vector<16x16xf32>
    %37 = vector.broadcast %1 : f32 to vector<16x16xf32>
    %38 = arith.mulf %36, %37 : vector<16x16xf32>
    %cst_17 = arith.constant dense<0xFF800000> : vector<16xf32>
    %39 = vector.multi_reduction <maximumf>, %38, %cst_17 [1] : vector<16x16xf32> to vector<16xf32>
    %40 = vector.shape_cast %39 : vector<16xf32> to vector<16x1xf32>
    %41 = vector.broadcast %40 : vector<16x1xf32> to vector<16x16xf32>
    %42 = arith.subf %38, %41 : vector<16x16xf32>
    %43 = math.exp %42 : vector<16x16xf32>
    %cst_18 = arith.constant dense<0.000000e+00> : vector<16xf32>
    %44 = vector.multi_reduction <add>, %43, %cst_18 [1] : vector<16x16xf32> to vector<16xf32>
    %45 = vector.shape_cast %44 : vector<16xf32> to vector<16x1xf32>
    %46 = tpu.reciprocal %45 {approx = true} : vector<16x1xf32> -> vector<16x1xf32>
    %47 = vector.broadcast %46 : vector<16x1xf32> to vector<16x16xf32>
    %48 = arith.mulf %43, %47 : vector<16x16xf32>
    %49 = arith.addf %15, %48 : vector<16x16xf32>
    %50 = vector.extract_strided_slice %13 {offsets = [0, 32], sizes = [16, 32], strides = [1, 1]} : vector<16x160xf32> to vector<16x32xf32>
    %51 = vector.extract_strided_slice %13 {offsets = [0, 96], sizes = [16, 32], strides = [1, 1]} : vector<16x160xf32> to vector<16x32xf32>
    %cst_19 = arith.constant dense<0.000000e+00> : vector<16x16xf32>
    %52 = tpu.matmul %50, %51, %cst_19 {dimension_numbers = #tpu.dot_dimension_numbers<[1], [1], [0], [0], [0, 0, 1, 0], [], []>} : vector<16x32xf32>, vector<16x32xf32>, vector<16x16xf32> -> vector<16x16xf32>
    %cst_20 = arith.constant 0.176776692 : f32
    %53 = vector.broadcast %cst_20 : f32 to vector<16x16xf32>
    %54 = arith.mulf %52, %53 : vector<16x16xf32>
    %55 = vector.broadcast %0 : f32 to vector<16x16xf32>
    %56 = arith.mulf %54, %55 : vector<16x16xf32>
    %57 = arith.addf %56, %4 : vector<16x16xf32>
    %cst_21 = arith.constant dense<0xFF800000> : vector<16xf32>
    %58 = vector.multi_reduction <maximumf>, %57, %cst_21 [1] : vector<16x16xf32> to vector<16xf32>
    %59 = vector.shape_cast %58 : vector<16xf32> to vector<16x1xf32>
    %60 = vector.broadcast %59 : vector<16x1xf32> to vector<16x16xf32>
    %61 = arith.subf %57, %60 : vector<16x16xf32>
    %62 = math.exp %61 : vector<16x16xf32>
    %cst_22 = arith.constant dense<0.000000e+00> : vector<16xf32>
    %63 = vector.multi_reduction <add>, %62, %cst_22 [1] : vector<16x16xf32> to vector<16xf32>
    %64 = vector.shape_cast %63 : vector<16xf32> to vector<16x1xf32>
    %65 = math.log %64 : vector<16x1xf32>
    %66 = arith.addf %59, %65 : vector<16x1xf32>
    %67 = vector.broadcast %66 : vector<16x1xf32> to vector<16x16xf32>
    %68 = arith.subf %57, %67 : vector<16x16xf32>
    %c0_23 = arith.constant 0 : index
    %c64 = arith.constant 64 : index
    %69 = vector.load %arg2[%c0_23, %c64] : memref<16x128xf32, #tpu.memory_space<vmem>>, vector<16x16xf32>
    %70 = arith.addf %68, %69 : vector<16x16xf32>
    %71 = vector.broadcast %1 : f32 to vector<16x16xf32>
    %72 = arith.mulf %70, %71 : vector<16x16xf32>
    %cst_24 = arith.constant dense<0xFF800000> : vector<16xf32>
    %73 = vector.multi_reduction <maximumf>, %72, %cst_24 [1] : vector<16x16xf32> to vector<16xf32>
    %74 = vector.shape_cast %73 : vector<16xf32> to vector<16x1xf32>
    %75 = vector.broadcast %74 : vector<16x1xf32> to vector<16x16xf32>
    %76 = arith.subf %72, %75 : vector<16x16xf32>
    %77 = math.exp %76 : vector<16x16xf32>
    %cst_25 = arith.constant dense<0.000000e+00> : vector<16xf32>
    %78 = vector.multi_reduction <add>, %77, %cst_25 [1] : vector<16x16xf32> to vector<16xf32>
    %79 = vector.shape_cast %78 : vector<16xf32> to vector<16x1xf32>
    %80 = tpu.reciprocal %79 {approx = true} : vector<16x1xf32> -> vector<16x1xf32>
    %81 = vector.broadcast %80 : vector<16x1xf32> to vector<16x16xf32>
    %82 = arith.mulf %77, %81 : vector<16x16xf32>
    %83 = arith.addf %49, %82 : vector<16x16xf32>
    %84 = arith.mulf %83, %3 : vector<16x16xf32>
    %c48_26 = arith.constant 48 : index
    %c0_27 = arith.constant 0 : index
    %85 = vector.load %arg3[%c48_26, %c0_27] : memref<88x256xf32, #tpu.memory_space<vmem>>, vector<32x66xf32>
    %cst_28 = arith.constant dense<0.000000e+00> : vector<16x66xf32>
    %86 = tpu.matmul %14, %85, %cst_28 {dimension_numbers = #tpu.dot_dimension_numbers<[1], [0], [0], [1], [0, 0, 1, 1], [], []>} : vector<16x32xf32>, vector<32x66xf32>, vector<16x66xf32> -> vector<16x66xf32>
    %cst_29 = arith.constant 0.000000e+00 : f32
    %87 = vector.broadcast %cst_29 : f32 to vector<16x32xf32>
    %88 = vector.extract_strided_slice %86 {offsets = [0, 0], sizes = [16, 32], strides = [1, 1]} : vector<16x66xf32> to vector<16x32xf32>
    %89 = vector.extract_strided_slice %86 {offsets = [0, 64], sizes = [16, 1], strides = [1, 1]} : vector<16x66xf32> to vector<16x1xf32>
    %c80 = arith.constant 80 : index
    %c0_30 = arith.constant 0 : index
    %90 = vector.load %arg3[%c80, %c0_30] : memref<88x256xf32, #tpu.memory_space<vmem>>, vector<1x32xf32>
    %cst_31 = arith.constant dense<0.000000e+00> : vector<1x16xf32>
    %91 = tpu.matmul %90, %88, %cst_31 {dimension_numbers = #tpu.dot_dimension_numbers<[1], [1], [0], [0], [0, 0, 1, 0], [], []>} : vector<1x32xf32>, vector<16x32xf32>, vector<1x16xf32> -> vector<1x16xf32>
    %92 = vector.broadcast %89 : vector<16x1xf32> to vector<16x16xf32>
    %93 = vector.broadcast %91 : vector<1x16xf32> to vector<16x16xf32>
    %94 = arith.addf %92, %93 : vector<16x16xf32>
    %cst_32 = arith.constant 0.000000e+00 : f32
    %95 = vector.broadcast %cst_32 : f32 to vector<16x16xf32>
    %96 = arith.cmpf ogt, %94, %95 : vector<16x16xf32>
    %cst_33 = arith.constant 2.000000e-01 : f32
    %97 = vector.broadcast %cst_33 : f32 to vector<16x16xf32>
    %98 = arith.mulf %97, %94 : vector<16x16xf32>
    %99 = arith.select %96, %94, %98 : vector<16x16xi1>, vector<16x16xf32>
    %cst_34 = arith.constant 0.000000e+00 : f32
    %100 = vector.broadcast %cst_34 : f32 to vector<16x16xf32>
    %101 = arith.cmpf ogt, %84, %100 : vector<16x16xf32>
    %cst_35 = arith.constant -1.000000e+09 : f32
    %102 = vector.broadcast %cst_35 : f32 to vector<16x16xf32>
    %103 = arith.select %101, %99, %102 : vector<16x16xi1>, vector<16x16xf32>
    %cst_36 = arith.constant dense<0xFF800000> : vector<16xf32>
    %104 = vector.multi_reduction <maximumf>, %103, %cst_36 [1] : vector<16x16xf32> to vector<16xf32>
    %105 = vector.shape_cast %104 : vector<16xf32> to vector<16x1xf32>
    %106 = vector.broadcast %105 : vector<16x1xf32> to vector<16x16xf32>
    %107 = arith.subf %103, %106 : vector<16x16xf32>
    %108 = math.exp %107 : vector<16x16xf32>
    %cst_37 = arith.constant dense<0.000000e+00> : vector<16xf32>
    %109 = vector.multi_reduction <add>, %108, %cst_37 [1] : vector<16x16xf32> to vector<16xf32>
    %110 = vector.shape_cast %109 : vector<16xf32> to vector<16x1xf32>
    %111 = tpu.reciprocal %110 {approx = true} : vector<16x1xf32> -> vector<16x1xf32>
    %112 = vector.broadcast %111 : vector<16x1xf32> to vector<16x16xf32>
    %113 = arith.mulf %108, %112 : vector<16x16xf32>
    %cst_38 = arith.constant dense<0.000000e+00> : vector<16x32xf32>
    %114 = tpu.matmul %113, %88, %cst_38 {dimension_numbers = #tpu.dot_dimension_numbers<[1], [0], [0], [1], [0, 0, 1, 1], [], []>} : vector<16x16xf32>, vector<16x32xf32>, vector<16x32xf32> -> vector<16x32xf32>
    %115 = arith.addf %87, %114 : vector<16x32xf32>
    %116 = vector.extract_strided_slice %86 {offsets = [0, 32], sizes = [16, 32], strides = [1, 1]} : vector<16x66xf32> to vector<16x32xf32>
    %117 = vector.extract_strided_slice %86 {offsets = [0, 65], sizes = [16, 1], strides = [1, 1]} : vector<16x66xf32> to vector<16x1xf32>
    %c81 = arith.constant 81 : index
    %c0_39 = arith.constant 0 : index
    %118 = vector.load %arg3[%c81, %c0_39] : memref<88x256xf32, #tpu.memory_space<vmem>>, vector<1x32xf32>
    %cst_40 = arith.constant dense<0.000000e+00> : vector<1x16xf32>
    %119 = tpu.matmul %118, %116, %cst_40 {dimension_numbers = #tpu.dot_dimension_numbers<[1], [1], [0], [0], [0, 0, 1, 0], [], []>} : vector<1x32xf32>, vector<16x32xf32>, vector<1x16xf32> -> vector<1x16xf32>
    %120 = vector.broadcast %117 : vector<16x1xf32> to vector<16x16xf32>
    %121 = vector.broadcast %119 : vector<1x16xf32> to vector<16x16xf32>
    %122 = arith.addf %120, %121 : vector<16x16xf32>
    %cst_41 = arith.constant 0.000000e+00 : f32
    %123 = vector.broadcast %cst_41 : f32 to vector<16x16xf32>
    %124 = arith.cmpf ogt, %122, %123 : vector<16x16xf32>
    %cst_42 = arith.constant 2.000000e-01 : f32
    %125 = vector.broadcast %cst_42 : f32 to vector<16x16xf32>
    %126 = arith.mulf %125, %122 : vector<16x16xf32>
    %127 = arith.select %124, %122, %126 : vector<16x16xi1>, vector<16x16xf32>
    %cst_43 = arith.constant 0.000000e+00 : f32
    %128 = vector.broadcast %cst_43 : f32 to vector<16x16xf32>
    %129 = arith.cmpf ogt, %84, %128 : vector<16x16xf32>
    %cst_44 = arith.constant -1.000000e+09 : f32
    %130 = vector.broadcast %cst_44 : f32 to vector<16x16xf32>
    %131 = arith.select %129, %127, %130 : vector<16x16xi1>, vector<16x16xf32>
    %cst_45 = arith.constant dense<0xFF800000> : vector<16xf32>
    %132 = vector.multi_reduction <maximumf>, %131, %cst_45 [1] : vector<16x16xf32> to vector<16xf32>
    %133 = vector.shape_cast %132 : vector<16xf32> to vector<16x1xf32>
    %134 = vector.broadcast %133 : vector<16x1xf32> to vector<16x16xf32>
    %135 = arith.subf %131, %134 : vector<16x16xf32>
    %136 = math.exp %135 : vector<16x16xf32>
    %cst_46 = arith.constant dense<0.000000e+00> : vector<16xf32>
    %137 = vector.multi_reduction <add>, %136, %cst_46 [1] : vector<16x16xf32> to vector<16xf32>
    %138 = vector.shape_cast %137 : vector<16xf32> to vector<16x1xf32>
    %139 = tpu.reciprocal %138 {approx = true} : vector<16x1xf32> -> vector<16x1xf32>
    %140 = vector.broadcast %139 : vector<16x1xf32> to vector<16x16xf32>
    %141 = arith.mulf %136, %140 : vector<16x16xf32>
    %cst_47 = arith.constant dense<0.000000e+00> : vector<16x32xf32>
    %142 = tpu.matmul %141, %116, %cst_47 {dimension_numbers = #tpu.dot_dimension_numbers<[1], [0], [0], [1], [0, 0, 1, 1], [], []>} : vector<16x16xf32>, vector<16x32xf32>, vector<16x32xf32> -> vector<16x32xf32>
    %143 = arith.addf %115, %142 : vector<16x32xf32>
    %cst_48 = arith.constant 5.000000e-01 : f32
    %144 = vector.broadcast %cst_48 : f32 to vector<16x32xf32>
    %145 = arith.mulf %143, %144 : vector<16x32xf32>
    %c0_49 = arith.constant 0 : index
    %c0_50 = arith.constant 0 : index
    %146 = vector.load %arg5[%c0_49, %c0_50] : memref<16x32xf32, #tpu.memory_space<vmem>>, vector<16x32xf32>
    tpu.vector_store %arg5[%c0_49, %c0_50], %145 {strides = array<i32>} : memref<16x32xf32, #tpu.memory_space<vmem>>, vector<16x32xf32>,
    %c0_51 = arith.constant 0 : index
    %147 = memref.load %arg1[%c0_51] : memref<2xi32, #tpu.memory_space<smem>>
    %c8_i32 = arith.constant 8 : i32
    %148 = arith.subi %c8_i32, %147 : i32
    %c8_i32_52 = arith.constant 8 : i32
    %c0_i32 = arith.constant 0 : i32
    %149 = arith.cmpi eq, %c8_i32_52, %c0_i32 : i32
    %c1_i32 = arith.constant 1 : i32
    %150 = arith.select %149, %c1_i32, %c8_i32_52 : i32
    %151 = arith.remsi %148, %150 : i32
    %c0_i32_53 = arith.constant 0 : i32
    %152 = arith.cmpi ne, %151, %c0_i32_53 : i32
    %c0_i32_54 = arith.constant 0 : i32
    %153 = arith.cmpi slt, %151, %c0_i32_54 : i32
    %c0_i32_55 = arith.constant 0 : i32
    %154 = arith.cmpi slt, %150, %c0_i32_55 : i32
    %155 = arith.xori %153, %154 : i1
    %156 = arith.andi %155, %152 : i1
    %157 = arith.addi %151, %150 : i32
    %158 = arith.select %156, %157, %151 : i32
    %c0_i32_56 = arith.constant 0 : i32
    %159 = arith.addi %c0_i32_56, %158 : i32
    %160 = arith.index_cast %159 : i32 to index
    %c0_57 = arith.constant 0 : index
    %161 = vector.load %arg5[%160, %c0_57] : memref<16x32xf32, #tpu.memory_space<vmem>>, vector<1x32xf32>
    %c0_58 = arith.constant 0 : index
    %c0_59 = arith.constant 0 : index
    %162 = vector.load %arg4[%c0_58, %c0_59] : memref<2x32xf32, #tpu.memory_space<vmem>>, vector<1x32xf32>
    tpu.vector_store %arg4[%c0_58, %c0_59], %161 {strides = array<i32>} : memref<2x32xf32, #tpu.memory_space<vmem>>, vector<1x32xf32>,
    %c1 = arith.constant 1 : index
    %163 = memref.load %arg1[%c1] : memref<2xi32, #tpu.memory_space<smem>>
    %c8_i32_60 = arith.constant 8 : i32
    %164 = arith.subi %c8_i32_60, %163 : i32
    %c8_i32_61 = arith.constant 8 : i32
    %c0_i32_62 = arith.constant 0 : i32
    %165 = arith.cmpi eq, %c8_i32_61, %c0_i32_62 : i32
    %c1_i32_63 = arith.constant 1 : i32
    %166 = arith.select %165, %c1_i32_63, %c8_i32_61 : i32
    %167 = arith.remsi %164, %166 : i32
    %c0_i32_64 = arith.constant 0 : i32
    %168 = arith.cmpi ne, %167, %c0_i32_64 : i32
    %c0_i32_65 = arith.constant 0 : i32
    %169 = arith.cmpi slt, %167, %c0_i32_65 : i32
    %c0_i32_66 = arith.constant 0 : i32
    %170 = arith.cmpi slt, %166, %c0_i32_66 : i32
    %171 = arith.xori %169, %170 : i1
    %172 = arith.andi %171, %168 : i1
    %173 = arith.addi %167, %166 : i32
    %174 = arith.select %172, %173, %167 : i32
    %c8_i32_67 = arith.constant 8 : i32
    %175 = arith.addi %c8_i32_67, %174 : i32
    %176 = arith.index_cast %175 : i32 to index
    %c0_68 = arith.constant 0 : index
    %177 = vector.load %arg5[%176, %c0_68] : memref<16x32xf32, #tpu.memory_space<vmem>>, vector<1x32xf32>
    %c1_69 = arith.constant 1 : index
    %c0_70 = arith.constant 0 : index
    %178 = vector.load %arg4[%c1_69, %c0_70] : memref<2x32xf32, #tpu.memory_space<vmem>>, vector<1x32xf32>
    tpu.vector_store %arg4[%c1_69, %c0_70], %177 {strides = array<i32>} : memref<2x32xf32, #tpu.memory_space<vmem>>, vector<1x32xf32>,
    return
  }
}

</mosaic_0001>

<bundles_post_ra>
// kernel: lc_forward.1
= control target key start
LH: loop header
LB: loop body
LE: loop exit
PB: predicated region body
PF: predicated region fallthrough
CT: control target
= control target key end

     0   :  { %9 = vsyncpa [#allocation5], 0  ;;  %s1674_s0 = inlined_call_operand.vmem [shape: f32[3], index: 0, kind: input, shape index: {}]   ;;  %s1675_s1 = inlined_call_operand.vmem [shape: s32[2], index: 1, kind: input, shape index: {}]   ;;  %s1676_s2 = inlined_call_operand.vmem [shape: f32[16,128], index: 2, kind: input, shape index: {}]   ;;  %s1677_s3 = inlined_call_operand.vmem [shape: f32[88,256], index: 3, kind: input, shape index: {}]   ;;  %s1678_s4 = inlined_call_operand.hbm [shape: f32[2,32], index: 4, kind: output, shape index: {}]  }
   0x1   :  { %10 = vsyncpa [#allocation7], 0 }
   0x2   :  { %11 = vsyncpa [#allocation4], 0  ;;  %s18_s17 = sshll.u32 %s1674_s0, 4  ;;  %s28_s20 = sshll.u32 %s1675_s1, 4  ;;  %s19_s17 = int_to_ptr.vmem [resolvable:$true] %s18_s17  ;;  %s29_s20 = int_to_ptr.vmem [resolvable:$true] %s28_s20 }
   0x3   :  { %s1377_s21 = scalar_lea.vmem %s19_s17, 16  ;;  %p1382_p1 = scmp.lt.s32.totalorder %s19_s17, %s19_s17 }
   0x4   :  { %p1378_p0 = scmp.ne.s32.totalorder %s19_s17, %s1377_s21  ;;  %p1383_p2 = scmp.lt.s32.totalorder %s1377_s21, %s1377_s21 }
   0x6   :  { %p1384_p3 = por %p1383_p2, %p1382_p1 }
   0x8   :  { %p1385_p4 = pnand %p1384_p3, %p1378_p0 }
   0xa   :  { %1388 = shalt.err (!%p1385_p4)
}
   0xb   :  { %s1429_s22 = smov [#allocation3]   ;;  %s1389_s23 = scalar_lea.vmem %s29_s20, 16 }
   0xc   :  { %21 = dma.vmem_to_smem %s19_s17, 16, %s1429_s22, [#allocation5]  }
   0xd   :  { %p1390_p5 = scmp.ne.s32.totalorder %s29_s20, %s1389_s23  ;;  %p1394_p6 = scmp.lt.s32.totalorder %s29_s20, %s29_s20 }
   0xe   :  { %p1395_p7 = scmp.lt.s32.totalorder %s1389_s23, %s1389_s23 }
  0x10   :  { %p1396_p8 = por %p1395_p7, %p1394_p6 }
  0x12   :  { %p1397_p9 = pnand %p1396_p8, %p1390_p5 }
  0x14   :  { %1400 = shalt.err (!%p1397_p9)
}
  0x15   :  { %s1430_s0 = smov [#allocation6]  }
  0x16   :  { %31 = dma.vmem_to_smem %s29_s20, 16, %s1430_s0, [#allocation7]  }
  0x17   :  { %1423 = dma.done.wait [#allocation5], 16  }
  0x18   :  { %1424 = vsyncadd [#allocation5], 4294967280 }
  0x19   :  { %1425 = dma.done.wait [#allocation7], 16  }
  0x1a   :  { %1426 = vsyncadd [#allocation7], 4294967280 }
  0x1b   :  { %42 = sfence }
  0x1c   :  { %v47_v0 = vld [vmem:[%s1677_s3] sm:$0xff]  ;;  %v48_v1 = vld [vmem:[%s1677_s3 + $0x10] sm:$0xf]  ;;  %vm57_vm0 = vcmask 1043456   ;;  %vm1431_vm1 = vmmov 1   ;;  %vm50_vm3 = vcmask 97280  }
  0x1d   :  { %v1483_v2 = vld [vmem:[%s1676_s2] sm:$0xff]  ;;  %v1245_v3 = vpack.c.bf16 %v48_v1, %v47_v0  ;;  %vm1246_vm2 = vmpackc.low %vm57_vm0, %vm1431_vm1  ;;  %v139_v4 = vld [vmem:[%s1677_s3 + $0x28] sm:$0xff]  ;;  %v1432_v17 = vmov 0.0   ;;  %vm146_vm4 = vcmask 261120   ;;  %s1433_s22 = smov 96   ;;  %s1434_s23 = smov 64  }
  0x1e   :  { %1189 = vmatprep.mubr.msk.f32.mxu0 %vm50_vm3, %v1483_v2  ;;  %v141_v5 = vld [vmem:[%s1677_s3 + $0x38] sm:$0xff]  ;;  %v138_v6 = vld [vmem:[%s1677_s3 + $0x20] sm:$0xff]  ;;  %v140_v7 = vld [vmem:[%s1677_s3 + $0x30] sm:$0xff]  ;;  %217 = vmatprep.mubr.f32.mxu1 %v1432_v17  ;;  %s1435_s0 = smov 32   ;;  %v1436_v47 = vmov 0.0|0.0   ;;  %s43_s5 = sld [smem:[#allocation3]] }
  0x1f   :  { %1247 = vmatprep.subr.msk.bf16.mxu0 %vm1246_vm2, %v1245_v3  ;;  %v1251_v8 = vpack.c.bf16 %v141_v5, %v139_v4  ;;  %v1253_v9 = vpack.c.bf16 %v140_v7, %v138_v6  ;;  %v1501_v10 = vld [vmem:[%s1676_s2 + $0x8] sm:$0xff]  ;;  %v145_v12 = vld [vmem:[%s1677_s3 + $0x58] sm:$0xff]  ;;  %v142_v14 = vld [vmem:[%s1677_s3 + $0x40] sm:$0xff]  ;;  %vm332_vm6 = vcmask 130048   ;;  %vm1437_vm7 = vmmov 0   ;;  %s1438_s8 = smov 80  }
  0x20   :  { %1250 = vmatpush3.bf16.msk.msra.mxu0 %vm1246_vm2, %v1245_v3  ;;  %v143_v11 = vld [vmem:[%s1677_s3 + $0x48] sm:$0xff]  ;;  %v144_v15 = vld [vmem:[%s1677_s3 + $0x50] sm:$0xff]  ;;  %v559_v32 = vld [vmem:[%s1677_s3 + $0x60] sm:$0xff]  ;;  %s1119_s11 = sld [smem:[#allocation3 + $0x2]]  ;;  %s1064_s12 = sld [smem:[#allocation6]]  ;;  %vm1080_vm14 = vcmask 253952  }
  0x21   :  { %1252 = vmatprep.subr.bf16.mxu1 %v1251_v8  ;;  %v1255_v13 = vpack.c.bf16 %v145_v12, %v143_v11  ;;  %v1257_v16 = vpack.c.bf16 %v144_v15, %v142_v14  ;;  %v49_v18 = vld [vmem:[%s1677_s3 + $0x14] ss:$0 sm:$0xff]  ;;  %vm1540_vm5 = vmpackc.low %vm146_vm4, %vm146_vm4  ;;  %v561_v43 = vld [vmem:[%s1677_s3 + $0x80] sm:$0xff]  ;;  %s1148_s13 = sld [smem:[#allocation6 + $0x1]]  ;;  %s1442_s1 = smov [#allocation8]  }
  0x22   :  { %1254 = vmatpush1.bf16.msra.mxu1 %v1253_v9  ;;  %v560_v33 = vld [vmem:[%s1677_s3 + $0x70] sm:$0xff]  ;;  %s1106_s24 = sshll.u32 %s1442_s1, 4  ;;  %s1107_s24 = int_to_ptr.vmem [resolvable:$true] %s1106_s24 }
  0x23   :  { %1190 = vmatmul.mubr.msk.f32.vlgmr.msra.gmra.mrb[0].mxu0 %vm50_vm3, %v1501_v10  ;;  %1256 = vmatprep.subr.bf16.mxu1 %v1255_v13  ;;  %v1271_v38 = vpack.c.bf16 %v560_v33, %v559_v32  ;;  %v562_v44 = vld [vmem:[%s1677_s3 + $0x90] sm:$0xff]  ;;  %v644_v13 = vld [vmem:[%s1677_s3 + $0xa0] ss:$0 sm:$0xff]  ;;  %s1401_s27 = scalar_lea.vmem %s1107_s24, 32  ;;  %p1406_p1 = scmp.lt.s32.totalorder %s1107_s24, %s1107_s24 }
  0x24   :  { %v1275_v45 = vpack.c.bf16 %v562_v44, %v561_v43  ;;  %v321_v50 = vstv %s43_s5  ;;  %p1402_p0 = scmp.ne.s32.totalorder %s1107_s24, %s1401_s27  ;;  %p1407_p2 = scmp.lt.s32.totalorder %s1401_s27, %s1401_s27 }
  0x26   :  { %1258 = vmatpush1.bf16.msra.mxu1 %v1257_v16  ;;  %s1065_s14 = ssub.s32 8, %s1064_s12  ;;  %p1408_p3 = por %p1407_p2, %p1406_p1 }
  0x27   :  { %s1083_s15 = ssub.s32 8, %s1148_s13  ;;  %s1067_s16 = ssub.s32 0, %s1065_s14 }
  0x28   :  { %s1085_s17 = ssub.s32 0, %s1083_s15  ;;  %s1145_s18 = smin.u32 %s1067_s16, %s1065_s14 }
  0x29   :  { %s1149_s19 = smin.u32 %s1085_s17, %s1083_s15  ;;  %s1069_s2 = sand.u32 7, %s1145_s18  }
  0x2a   :  { %p1066_p10 = scmp.lt.s32.totalorder %s1065_s14, 0  ;;  %s1087_s20 = sand.u32 7, %s1149_s19  }
  0x2b   :  { %s1070_s21 = ssub.s32 0, %s1069_s2  ;;  %p1084_p11 = scmp.lt.s32.totalorder %s1083_s15, 0 }
  0x2c   :  { %s1682_s21 = smov (!%p1066_p10, %s1070_s21), %s1069_s2  ;;  %p1409_p4 = pnand %p1408_p3, %p1402_p0 }
  0x2d   :  { %p1147_p12 = scmp.lt.s32.totalorder %s1682_s21, 0 }
  0xf6   :  { %v1191_v19 = vpop.f32.mrb[0].mxu0 }
  0xf7   :  { %v127_v20 = vpop.f32.mrb[1].mxu0  ;;  %v133_v22 = vadd.f32 %v1191_v19, %v49_v18 }
  0xf8   :  { %v128_v21 = vadd.f32 %v127_v20, %v49_v18 }
  0xf9   :  { %v137_v24 = vmax.f32 %v133_v22, 0.0 }
  0xfa   :  { %v136_v23 = vmax.f32 %v128_v21, 0.0 }
  0xfc   :  { %1123 = vmatmul.mubr.msk.f32.vlgmr.msra.gmra.mrb[0].mxu1 %vm146_vm4, %v136_v23 }
  0xfd   :  { %223 = vmatprep.mubr.f32.mxu1 %v1432_v17 }
 0x100   :  { %1124 = vmatmul.mubr.msk.f32.gmra.mrb[2].mxu1 %vm146_vm4, %v137_v24 }
 0x1cf   :  { %v219_v25 = vpop.f32.mrb[0].mxu1 }
 0x1d0   :  { %394 = vrot.lane.b32.xlu1 %v219_v25, %s1433_s22  ;;  %v221_v26 = vpop.f32.mrb[1].mxu1  ;;  %1196 = vmatprep.mubr.msk.f32.mxu0 %vm146_vm4, %v219_v25 }
 0x1d3   :  { %v225_v27 = vpop.f32.mrb[2].mxu1 }
 0x1d4   :  { %396 = vrot.lane.b32.xlu1 %v225_v27, %s1433_s22  ;;  %v227_v28 = vpop.f32.mrb[3].mxu1  ;;  %v1311_v29 = vpack.i.bf16 %v225_v27, %v219_v25 }
 0x1d6   :  { %1312 = vrot.lane.b32.xlu0 %v1311_v29, %s1434_s23 }
 0x1d8   :  { %326 = vrot.lane.b32.xlu1 %v1501_v10, %s1433_s22 }
 0x1da   :  { %1317 = vrot.lane.b32.xlu0 %v1311_v29, %s1435_s0 }
 0x1de   :  { %324 = vrot.lane.b32.xlu0 %v1483_v2, %s1433_s22 }
 0x242   :  { %v395_v30 = vpop.permute.xlu1 %394 }
 0x243   :  { %1203 = vmatprep.mubr.msk.f32.mxu1 %vm146_vm4, %v395_v30 }
 0x246   :  { %v397_v46 = vpop.permute.xlu1 %396 }
 0x248   :  { %v1313_v31 = vpop.permute.xlu0 %1312 }
 0x249   :  { %v1315_v34 = vunpack.i.h.bf16 %v1313_v31  ;;  %v1314_v35 = vunpack.i.l.bf16 %v1313_v31 }
 0x24a   :  { %v327_v57 = vpop.permute.xlu1 %326 }
 0x24b   :  { %v1259_v37 = vpack.c.bf16 %v1315_v34, %v1314_v35 }
 0x24c   :  { %v1318_v39 = vpop.permute.xlu0 %1317 }
 0x24d   :  { %v1320_v40 = vunpack.i.h.bf16 %v1318_v39  ;;  %v1319_v41 = vunpack.i.l.bf16 %v1318_v39  ;;  %1261 = vmatprep.subr.msk.bf16.mxu0 %vm1540_vm5, %v1259_v37 }
 0x24e   :  { %1264 = vmatpush3.bf16.xpose.msk.msra.mxu0 %vm1540_vm5, %v1259_v37 }
 0x24f   :  { %v1265_v42 = vpack.c.bf16 %v1320_v40, %v1319_v41  ;;  %1272 = vmatprep.subr.bf16.mxu0 %v1271_v38 }
 0x250   :  { %v325_v53 = vpop.permute.xlu0 %324 }
 0x251   :  { %1267 = vmatprep.subr.msk.bf16.mxu1 %vm1540_vm5, %v1265_v42 }
 0x252   :  { %1270 = vmatpush3.bf16.xpose.msk.msra.mxu1 %vm1540_vm5, %v1265_v42 }
 0x253   :  { %1279 = vmatprep.subr.bf16.mxu1 %v1436_v47 }
 0x255   :  { %1197 = vmatmul.mubr.msk.f32.vlgmr.msra.gmra.mrb[2].mxu0 %vm146_vm4, %v225_v27 }
 0x256   :  { %1274 = vmatpush3.bf16.msra.mxu0 %v1271_v38  ;;  %1214 = vmatprep.mubr.msk.f32.mxu0 %vm146_vm4, %v221_v26  ;;  %v770_v38 = vld [vmem:[%s1677_s3 + $0xa1] ss:$0 sm:$0xff]  ;;  %s1441_s3 = smov 112  }
 0x257   :  { %1276 = vmatprep.subr.bf16.mxu0 %v1275_v45 }
 0x259   :  { %1204 = vmatmul.mubr.msk.f32.vlgmr.msra.gmra.mrb[4].mxu1 %vm146_vm4, %v397_v46 }
 0x25a   :  { %1278 = vmatpush3.bf16.msra.mxu0 %v1275_v45  ;;  %1221 = vmatprep.mubr.msk.f32.mxu1 %vm1437_vm7, %v1432_v17 }
 0x25b   :  { %1283 = vmatprep.subr.bf16.mxu0 %v1436_v47 }
 0x25d   :  { %1215 = vmatmul.mubr.msk.f32.vlgmr.msra.gmra.mrb[4].mxu0 %vm146_vm4, %v227_v28 }
 0x25e   :  { %1228 = vmatprep.mubr.msk.f32.mxu0 %vm1437_vm7, %v1432_v17 }
 0x328   :  { %v1198_v48 = vpop.f32.mrb[2].mxu0 }
 0x329   :  { %v320_v49 = vmul.f32 0.17677669, %v1198_v48  ;;  %v310_v51 = vpop.f32.mrb[3].mxu0 }
 0x32a   :  { %v319_v52 = vmul.f32 0.17677669, %v310_v51 }
 0x32b   :  { %v323_v54 = vmul.f32 %v321_v50, %v320_v49 }
 0x32c   :  { %v322_v55 = vmul.f32 %v321_v50, %v319_v52  ;;  %v1205_v56 = vpop.f32.mrb[4].mxu1 }
 0x32d   :  { %v486_v58 = vmul.f32 0.17677669, %v1205_v56  ;;  %v476_v59 = vpop.f32.mrb[5].mxu1  ;;  %v1564_v62 = vadd.f32 %v327_v57, %v323_v54 }
 0x32e   :  { %v1562_v60 = vadd.f32 %v325_v53, %v322_v55  ;;  %v485_v61 = vmul.f32 0.17677669, %v476_v59 }
 0x32f   :  { %v488_v63 = vmul.f32 %v486_v58, %v321_v50  ;;  %v336_v11 = vsel %vm332_vm6, %v1564_v62, -inf }
 0x330   :  { %v487_v0 = vmul.f32 %v485_v61, %v321_v50  ;;  %v1566_v1 = vpop.f32.mrb[4].mxu0  ;;  %v333_v3 = vsel %vm332_vm6, %v1562_v60, -inf }
 0x331   :  { %v1570_v4 = vpop.f32.mrb[5].mxu0  ;;  %334 = vmax.xlane.f32.xlu0 %v333_v3  ;;  %v1580_v8 = vadd.f32 %v488_v63, %v327_v57 }
 0x332   :  { %v1572_v5 = vadd.f32 %v487_v0, %v325_v53  ;;  %v1576_v6 = vpack.c.bf16 %v1566_v1, %v1570_v4  ;;  %v1321_v7 = vpack.i.bf16 %v1566_v1, %v1570_v4 }
 0x333   :  { %v494_v12 = vsel %vm332_vm6, %v1580_v8, -inf }
 0x334   :  { %1282 = vmatpush3.bf16.xpose.msk.msra.mxu1 %vm1540_vm5, %v1576_v6  ;;  %v491_v9 = vsel %vm332_vm6, %v1572_v5, -inf }
 0x335   :  { %492 = vmax.xlane.f32.xlu1 %v491_v9  ;;  %337 = vmax.xlane.f32.xlu0 %v336_v11 }
 0x339   :  { %495 = vmax.xlane.f32.xlu0 %v494_v12 }
 0x33b   :  { %1222 = vmatmul.mubr.msk.f32.vlgmr.msra.gmra.mrb[6].mxu1 %vm146_vm4, %v644_v13 }
 0x346   :  { %1322 = vrot.lane.b32.xlu1 %v1321_v7, %s1433_s22  ;;  %v367_v7 = vstv %s1119_s11  ;;  %s1088_s22 = ssub.s32 0, %s1087_s20 }
 0x347   :  { %s1684_s22 = smov (!%p1084_p11, %s1088_s22), %s1087_s20 }
 0x348   :  { %p1151_p13 = scmp.lt.s32.totalorder %s1684_s22, 0  ;;  %s1094_s0 = sadd.s32 8, %s1684_s22 }
 0x34a   :  { %359 = vrot.lane.b32.xlu1 %v1483_v2, %s1438_s8  ;;  %s1688_s0 = smov (!%p1151_p13, %s1094_s0), %s1684_s22 }
 0x34b   :  { %s1117_s26 = scalar_lea.vmem [#allocation2], %s1688_s0 }
 0x34e   :  { %361 = vrot.lane.b32.xlu1 %v1501_v10, %s1438_s8 }
 0x352   :  { %519 = vrot.lane.b32.xlu1 %v1501_v10, %s1434_s23 }
 0x3be   :  { %v335_v14 = vpop.xlane.xlu0 %334 }
 0x3bf   :  { %v339_v20 = vsub.f32 %v1562_v60, %v335_v14 }
 0x3c1   :  { %v341_v27 = vmul.f32 1.442695, %v339_v20 }
 0x3c2   :  { %v1602_v15 = vpop.xlane.xlu1 %492  ;;  %v338_v16 = vpop.xlane.xlu0 %337 }
 0x3c3   :  { %v340_v18 = vsub.f32 %v1564_v62, %v338_v16  ;;  %v497_v28 = vsub.f32 %v1572_v5, %v1602_v15 }
 0x3c5   :  { %v343_v19 = vmul.f32 1.442695, %v340_v18  ;;  %v499_v29 = vmul.f32 1.442695, %v497_v28 }
 0x3c6   :  { %v1323_v17 = vpop.permute.xlu1 %1322  ;;  %v496_v21 = vpop.xlane.xlu0 %495 }
 0x3c7   :  { %v1325_v22 = vunpack.i.h.bf16 %v1323_v17  ;;  %v1324_v23 = vunpack.i.l.bf16 %v1323_v17  ;;  %v498_v24 = vsub.f32 %v1580_v8, %v496_v21  ;;  %1329 = vpow2.f32 %v343_v19 }
 0x3c8   :  { %v1439_v19 = vmov 65  }
 0x3c9   :  { %v1284_v25 = vpack.c.bf16 %v1325_v22, %v1324_v23  ;;  %v501_v26 = vmul.f32 1.442695, %v498_v24  ;;  %1327 = vset.pattern.permute.xlu1 %v1439_v19  ;;  %1326 = vset.pattern.permute.xlu0 %v1439_v19 }
 0x3ca   :  { %v360_v46 = vpop.permute.xlu1 %359 }
 0x3cb   :  { %1331 = vpow2.f32 %v501_v26  ;;  %1286 = vmatpush3.bf16.xpose.msk.msra.mxu0 %vm1540_vm5, %v1284_v25  ;;  %1288 = vmatprep.subr.bf16.mxu1 %v1284_v25 }
 0x3cc   :  { %1290 = vmatpush3.bf16.msra.mxu1 %v1284_v25  ;;  %1333 = vpow2.f32 %v341_v27 }
 0x3cd   :  { %1292 = vmatprep.subr.bf16.mxu1 %v1576_v6  ;;  %1335 = vpow2.f32 %v499_v29 }
 0x3ce   :  { %v362_v51 = vpop.permute.xlu1 %361 }
 0x3d1   :  { %v1330_v30 = vpop.eup %1329 }
 0x3d2   :  { %v348_v31 = vsel %vm332_vm6, %v1330_v30, 0.0  ;;  %1229 = vmatmul.mubr.msk.f32.vlgmr.msra.gmra.mrb[6].mxu0 %vm146_vm4, %v770_v38  ;;  %v520_v0 = vpop.permute.xlu1 %519 }
 0x3d3   :  { %349 = vadd.xlane.f32.xlu0 %v348_v31 }
 0x3d5   :  { %v1332_v32 = vpop.eup %1331 }
 0x3d6   :  { %v506_v33 = vsel %vm332_vm6, %v1332_v32, 0.0  ;;  %v1334_v34 = vpop.eup %1333 }
 0x3d7   :  { %507 = vadd.xlane.f32.xlu0 %v506_v33  ;;  %v345_v35 = vsel %vm332_vm6, %v1334_v34, 0.0  ;;  %v1336_v36 = vpop.eup %1335 }
 0x3d8   :  { %v503_v37 = vsel %vm332_vm6, %v1336_v36, 0.0  ;;  %v1440_v36 = vmov 64  }
 0x3db   :  { %346 = vadd.xlane.f32.xlu0 %v345_v35 }
 0x3df   :  { %504 = vadd.xlane.f32.xlu0 %v503_v37 }
 0x3f5   :  { %517 = vrot.lane.b32.xlu0 %v1483_v2, %s1434_s23  ;;  %s1076_s23 = sadd.s32 8, %s1682_s21 }
 0x3f6   :  { %s1686_s23 = smov (!%p1147_p12, %s1076_s23), %s1682_s21 }
 0x3f7   :  { %s1078_s25 = scalar_lea.vmem [#allocation2], %s1686_s23 }
 0x40e   :  { %v720_v35 = vpop.f32.mrb[6].mxu1 }
 0x40f   :  { %v1223_v37 = vpop.f32.mrb[7].mxu1 }
 0x460   :  { %v350_v39 = vpop.xlane.xlu0 %349 }
 0x461   :  { %1337 = vlog2.f32 %v350_v39 }
 0x464   :  { %v508_v40 = vpop.xlane.xlu0 %507 }
 0x465   :  { %1339 = vlog2.f32 %v508_v40 }
 0x468   :  { %v347_v41 = vpop.xlane.xlu0 %346 }
 0x469   :  { %1341 = vlog2.f32 %v347_v41 }
 0x46b   :  { %v1338_v42 = vpop.eup %1337 }
 0x46c   :  { %v505_v43 = vpop.xlane.xlu0 %504  ;;  %v354_v44 = vmul.f32 0.6931472, %v1338_v42 }
 0x46d   :  { %1343 = vlog2.f32 %v505_v43 }
 0x46e   :  { %v356_v48 = vadd.f32 %v354_v44, %v338_v16 }
 0x46f   :  { %v1340_v45 = vpop.eup %1339 }
 0x470   :  { %v512_v47 = vmul.f32 0.6931472, %v1340_v45  ;;  %v358_v53 = vsub.f32 %v1564_v62, %v356_v48  ;;  %v518_v3 = vpop.permute.xlu0 %517  ;;  %v732_v45 = vlaneseq }
 0x472   :  { %v514_v54 = vadd.f32 %v512_v47, %v496_v21  ;;  %v366_v59 = vadd.f32 %v362_v51, %v358_v53  ;;  %v733_v47 = vshrl.u32 %v732_v45, 7 }
 0x473   :  { %v1342_v49 = vpop.eup %1341 }
 0x474   :  { %v352_v50 = vmul.f32 0.6931472, %v1342_v49  ;;  %v516_v61 = vsub.f32 %v1580_v8, %v514_v54 }
 0x476   :  { %v355_v52 = vadd.f32 %v352_v50, %v335_v14  ;;  %v524_v12 = vadd.f32 %v520_v0, %v516_v61  ;;  %v369_v14 = vmul.f32 %v367_v7, %v366_v59 }
 0x477   :  { %v1344_v55 = vpop.eup %1343 }
 0x478   :  { %v510_v56 = vmul.f32 0.6931472, %v1344_v55  ;;  %v357_v57 = vsub.f32 %v1562_v60, %v355_v52  ;;  %v373_v60 = vsel %vm332_vm6, %v369_v14, -inf  ;;  %v526_v8 = vmul.f32 %v524_v12, %v367_v7 }
 0x47a   :  { %v365_v58 = vadd.f32 %v360_v46, %v357_v57  ;;  %v513_v63 = vadd.f32 %v510_v56, %v1602_v15  ;;  %v530_v15 = vsel %vm332_vm6, %v526_v8, -inf }
 0x47c   :  { %v515_v9 = vsub.f32 %v1572_v5, %v513_v63  ;;  %v368_v11 = vmul.f32 %v367_v7, %v365_v58 }
 0x47e   :  { %v523_v13 = vadd.f32 %v518_v3, %v515_v9  ;;  %v370_v62 = vsel %vm332_vm6, %v368_v11, -inf }
 0x47f   :  { %371 = vmax.xlane.f32.xlu1 %v370_v62 }
 0x480   :  { %v525_v16 = vmul.f32 %v523_v13, %v367_v7 }
 0x482   :  { %v527_v18 = vsel %vm332_vm6, %v525_v16, -inf }
 0x483   :  { %374 = vmax.xlane.f32.xlu1 %v373_v60  ;;  %528 = vmax.xlane.f32.xlu0 %v527_v18 }
 0x487   :  { %531 = vmax.xlane.f32.xlu1 %v530_v15 }
 0x4a5   :  { %v848_v33 = vpop.f32.mrb[6].mxu0 }
 0x4a6   :  { %v1230_v34 = vpop.f32.mrb[7].mxu0 }
 0x50c   :  { %v372_v5 = vpop.xlane.xlu1 %371 }
 0x50d   :  { %v376_v20 = vsub.f32 %v368_v11, %v372_v5 }
 0x50f   :  { %v378_v22 = vmul.f32 1.442695, %v376_v20 }
 0x510   :  { %v375_v17 = vpop.xlane.xlu1 %374  ;;  %v529_v38 = vpop.xlane.xlu0 %528 }
 0x511   :  { %v377_v21 = vsub.f32 %v369_v14, %v375_v17  ;;  %v533_v39 = vsub.f32 %v525_v16, %v529_v38 }
 0x513   :  { %v380_v23 = vmul.f32 1.442695, %v377_v21  ;;  %v535_v40 = vmul.f32 1.442695, %v533_v39 }
 0x514   :  { %v532_v24 = vpop.xlane.xlu1 %531 }
 0x515   :  { %1345 = vpow2.f32 %v380_v23  ;;  %v534_v25 = vsub.f32 %v526_v8, %v532_v24 }
 0x516   :  { %1347 = vpow2.f32 %v378_v22 }
 0x517   :  { %v537_v26 = vmul.f32 1.442695, %v534_v25 }
 0x519   :  { %1349 = vpow2.f32 %v537_v26 }
 0x51a   :  { %1351 = vpow2.f32 %v535_v40 }
 0x51f   :  { %v1346_v27 = vpop.eup %1345 }
 0x520   :  { %v385_v28 = vsel %vm332_vm6, %v1346_v27, 0.0  ;;  %v1632_v29 = vpop.eup %1347 }
 0x521   :  { %386 = vadd.xlane.f32.xlu0 %v385_v28  ;;  %v382_v32 = vsel %vm332_vm6, %v1632_v29, 0.0 }
 0x523   :  { %v1350_v30 = vpop.eup %1349 }
 0x524   :  { %v542_v31 = vsel %vm332_vm6, %v1350_v30, 0.0  ;;  %v1352_v41 = vpop.eup %1351 }
 0x525   :  { %543 = vadd.xlane.f32.xlu1 %v542_v31  ;;  %383 = vadd.xlane.f32.xlu0 %v382_v32  ;;  %v539_v42 = vsel %vm332_vm6, %v1352_v41, 0.0 }
 0x536   :  { %857 = vperm.xlu1 %1327, %v1566_v1  }
 0x53a   :  { %1328 = vset.pattern.permute.xlu1 %v1440_v36 }
 0x53b   :  { %725 = vperm.xlu1 %1328, %v1570_v4   ;;  %853 = vperm.xlu0 %1326, %v1570_v4  }
 0x53f   :  { %551 = vrot.lane.b32.xlu1 %v1483_v2, %s1441_s3 }
 0x543   :  { %729 = vperm.xlu1 %1328, %v1566_v1   ;;  %v734_v1 = vsub.s32 0, %v733_v47 }
 0x545   :  { %v863_v48 = vrot.slane %v848_v33, %v734_v1  ;;  %v735_v0 = vrot.slane %v720_v35, %v734_v1 }
 0x567   :  { %540 = vadd.xlane.f32.xlu1 %v539_v42 }
 0x578   :  { %553 = vrot.lane.b32.xlu1 %v1501_v10, %s1441_s3 }
 0x5ae   :  { %v387_v4 = vpop.xlane.xlu0 %386 }
 0x5b2   :  { %v544_v43 = vpop.xlane.xlu1 %543  ;;  %v384_v50 = vpop.xlane.xlu0 %383 }
 0x5b3   :  { %1353 = vrcp.f32 %v544_v43 }
 0x5b4   :  { %1355 = vrcp.f32 %v387_v4 }
 0x5b5   :  { %1357 = vrcp.f32 %v384_v50 }
 0x5b6   :  { %v858_v44 = vpop.permute.xlu1 %857 }
 0x5b7   :  { %v865_v53 = vadd.f32 %v863_v48, %v858_v44 }
 0x5b9   :  { %v869_v56 = vmul.f32 0.2, %v865_v53  ;;  %vm867_vm8 = vcmp.gt.f32.partialorder %v865_v53, 0.0 }
 0x5ba   :  { %v726_v46 = vpop.permute.xlu1 %725  ;;  %v854_v61 = vpop.permute.xlu0 %853 }
 0x5bb   :  { %v871_v63 = vsel %vm867_vm8, %v865_v53, %v869_v56  ;;  %v864_v11 = vadd.f32 %v863_v48, %v854_v61  ;;  %v736_v13 = vadd.f32 %v735_v0, %v726_v46 }
 0x5bd   :  { %v1354_v49 = vpop.eup %1353  ;;  %v868_v16 = vmul.f32 0.2, %v864_v11  ;;  %vm866_vm10 = vcmp.gt.f32.partialorder %v864_v11, 0.0  ;;  %v740_v18 = vmul.f32 0.2, %v736_v13  ;;  %vm738_vm11 = vcmp.gt.f32.partialorder %v736_v13, 0.0 }
 0x5be   :  { %v552_v2 = vpop.permute.xlu1 %551  ;;  %v1356_v52 = vpop.eup %1355  ;;  %v548_v54 = vmul.f32 %v1354_v49, %v1350_v30 }
 0x5bf   :  { %v391_v10 = vmul.f32 %v1356_v52, %v1346_v27  ;;  %v1358_v7 = vpop.eup %1357  ;;  %v870_v19 = vsel %vm866_vm10, %v864_v11, %v868_v16  ;;  %v742_v21 = vsel %vm738_vm11, %v736_v13, %v740_v18 }
 0x5c0   :  { %v390_v62 = vmul.f32 %v1358_v7, %v1632_v29 }
 0x5c1   :  { %v550_v57 = vadd.f32 %v548_v54, %v391_v10 }
 0x5c2   :  { %v730_v51 = vpop.permute.xlu1 %729 }
 0x5c3   :  { %v737_v8 = vadd.f32 %v735_v0, %v730_v51 }
 0x5c5   :  { %v741_v20 = vmul.f32 0.2, %v737_v8  ;;  %vm739_vm13 = vcmp.gt.f32.partialorder %v737_v8, 0.0 }
 0x5c7   :  { %v743_v24 = vsel %vm739_vm13, %v737_v8, %v741_v20 }
 0x5f4   :  { %v541_v55 = vpop.xlane.xlu1 %540 }
 0x5f5   :  { %1359 = vrcp.f32 %v541_v55 }
 0x5f8   :  { %v554_v58 = vpop.permute.xlu1 %553 }
 0x5f9   :  { %v558_v59 = vmul.f32 %v554_v58, %v550_v57 }
 0x5fb   :  { %vm745_vm9 = vcmp.gt.f32.partialorder %v558_v59, 0.0 }
 0x5fc   :  { %v873_v3 = vsel %vm745_vm9, %v871_v63, -1e+09  ;;  %v747_v25 = vsel %vm745_vm9, %v743_v24, -1e+09 }
 0x5fd   :  { %v877_v9 = vsel %vm332_vm6, %v873_v3, -inf  ;;  %v751_v26 = vsel %vm332_vm6, %v747_v25, -inf }
 0x5fe   :  { %878 = vmax.xlane.f32.xlu0 %v877_v9 }
 0x5ff   :  { %v1360_v12 = vpop.eup %1359 }
 0x600   :  { %v547_v14 = vmul.f32 %v1360_v12, %v1352_v41 }
 0x602   :  { %v549_v60 = vadd.f32 %v547_v14, %v390_v62 }
 0x604   :  { %v557_v15 = vmul.f32 %v552_v2, %v549_v60 }
 0x606   :  { %vm744_vm12 = vcmp.gt.f32.partialorder %v557_v15, 0.0 }
 0x607   :  { %v872_v5 = vsel %vm744_vm12, %v870_v19, -1e+09  ;;  %v746_v22 = vsel %vm744_vm12, %v742_v21, -1e+09 }
 0x608   :  { %v874_v17 = vsel %vm332_vm6, %v872_v5, -inf  ;;  %v748_v23 = vsel %vm332_vm6, %v746_v22, -inf }
 0x609   :  { %875 = vmax.xlane.f32.xlu1 %v874_v17 }
 0x60d   :  { %749 = vmax.xlane.f32.xlu1 %v748_v23 }
 0x611   :  { %752 = vmax.xlane.f32.xlu1 %v751_v26 }
 0x68b   :  { %v879_v27 = vpop.xlane.xlu0 %878 }
 0x68c   :  { %v881_v28 = vsub.f32 %v873_v3, %v879_v27 }
 0x68e   :  { %v884_v29 = vmul.f32 1.442695, %v881_v28 }
 0x690   :  { %1361 = vpow2.f32 %v884_v29 }
 0x696   :  { %v876_v30 = vpop.xlane.xlu1 %875 }
 0x697   :  { %v880_v31 = vsub.f32 %v872_v5, %v876_v30 }
 0x699   :  { %v882_v32 = vmul.f32 1.442695, %v880_v31 }
 0x69a   :  { %v1362_v33 = vpop.eup %1361  ;;  %v750_v34 = vpop.xlane.xlu1 %749 }
 0x69b   :  { %1363 = vpow2.f32 %v882_v32  ;;  %v754_v35 = vsub.f32 %v746_v22, %v750_v34  ;;  %v889_v36 = vsel %vm332_vm6, %v1362_v33, 0.0 }
 0x69c   :  { %890 = vadd.xlane.f32.xlu1 %v889_v36 }
 0x69d   :  { %v756_v37 = vmul.f32 1.442695, %v754_v35 }
 0x69e   :  { %v753_v38 = vpop.xlane.xlu1 %752 }
 0x69f   :  { %1365 = vpow2.f32 %v756_v37  ;;  %v755_v39 = vsub.f32 %v747_v25, %v753_v38 }
 0x6a1   :  { %v758_v40 = vmul.f32 1.442695, %v755_v39 }
 0x6a3   :  { %1367 = vpow2.f32 %v758_v40 }
 0x6a5   :  { %v1364_v41 = vpop.eup %1363 }
 0x6a6   :  { %v886_v42 = vsel %vm332_vm6, %v1364_v41, 0.0 }
 0x6a7   :  { %887 = vadd.xlane.f32.xlu0 %v886_v42 }
 0x6a9   :  { %v1366_v43 = vpop.eup %1365 }
 0x6aa   :  { %v760_v44 = vsel %vm332_vm6, %v1366_v43, 0.0 }
 0x6ab   :  { %761 = vadd.xlane.f32.xlu0 %v760_v44 }
 0x6ad   :  { %v1368_v45 = vpop.eup %1367 }
 0x6ae   :  { %v763_v46 = vsel %vm332_vm6, %v1368_v45, 0.0 }
 0x6af   :  { %764 = vadd.xlane.f32.xlu1 %v763_v46 }
 0x729   :  { %v891_v4 = vpop.xlane.xlu1 %890 }
 0x72a   :  { %1369 = vrcp.f32 %v891_v4 }
 0x734   :  { %v888_v47 = vpop.xlane.xlu0 %887  ;;  %v1370_v48 = vpop.eup %1369 }
 0x735   :  { %1371 = vrcp.f32 %v888_v47  ;;  %v895_v51 = vmul.f32 %v1370_v48, %v1362_v33 }
 0x738   :  { %v762_v2 = vpop.xlane.xlu0 %761 }
 0x739   :  { %1373 = vrcp.f32 %v762_v2 }
 0x73c   :  { %v765_v1 = vpop.xlane.xlu1 %764 }
 0x73d   :  { %1375 = vrcp.f32 %v765_v1 }
 0x73f   :  { %v1372_v49 = vpop.eup %1371 }
 0x740   :  { %v894_v50 = vmul.f32 %v1372_v49, %v1364_v41 }
 0x742   :  { %1235 = vmatprep.mubr.msk.f32.mxu1 %vm332_vm6, %v894_v50 }
 0x743   :  { %v1374_v52 = vpop.eup %1373  ;;  %1236 = vmatmul.mubr.msk.f32.vlgmr.msra.gmra.mrb[8].mxu1 %vm332_vm6, %v895_v51 }
 0x744   :  { %1294 = vmatpush3.bf16.msra.mxu1 %v1576_v6  ;;  %v768_v53 = vmul.f32 %v1374_v52, %v1366_v43 }
 0x746   :  { %1242 = vmatprep.mubr.msk.f32.mxu1 %vm332_vm6, %v768_v53 }
 0x747   :  { %v1376_v54 = vpop.eup %1375 }
 0x748   :  { %v769_v55 = vmul.f32 %v1376_v54, %v1368_v45 }
 0x74b   :  { %1243 = vmatmul.mubr.msk.f32.vlgmr.msra.gmra.mrb[8].mxu1 %vm332_vm6, %v769_v55 }
 0x81e   :  { %v1244_v6 = vpop.f32.mrb[8].mxu1 }
 0x81f   :  { %v1061_v10 = vmul.f32 0.5, %v1244_v6  ;;  %v1051_v56 = vpop.f32.mrb[9].mxu1 }
 0x820   :  { %v1060_v57 = vmul.f32 0.5, %v1051_v56 }
 0x821   :  { %1063 = vst.msk [vmem:[#allocation2 + $0x8] sm:$0xff] %vm146_vm4, %v1061_v10 }
 0x822   :  { %1062 = vst.msk [vmem:[#allocation2] sm:$0xff] %vm146_vm4, %v1060_v57 }
 0x829   :  { %v1079_v58 = vld [vmem:[%s1078_s25] sm:$0x1]  ;;  %v1152_v59 = vld [vmem:[%s1117_s26 + $0x8] sm:$0x1] }
 0x82a   :  { %1081 = vst.msk [vmem:[#allocation8] sm:$0x1] %vm1080_vm14, %v1079_v58  ;;  %1099 = vst.msk [vmem:[#allocation8 + $0x1] sm:$0x1] %vm1080_vm14, %v1152_v59 }
 0x82b   :  { %1412 = shalt.err (!%p1409_p4)
}
 0x82c   :  { %s1413_s30 = scalar_lea.hbm %s1678_s4, 32 }
 0x82d   :  { %p1414_p5 = scmp.ne.s32.totalorder %s1678_s4, %s1413_s30  ;;  %p1417_p6 = scmp.lt.u32.totalorder %s1413_s30, %s1678_s4 }
 0x82f   :  { %p1419_p7 = pnand %p1417_p6, %p1414_p5 }
 0x831   :  { %1422 = shalt.err (!%p1419_p7)
}
 0x832   :  { %1109 = dma.vmem_to_hbm [thread:$0]  %s1107_s24, 32, %s1678_s4, [#allocation4]  }
 0x833   :  { %1427 = dma.done.wait [#allocation4], 32  }
 0x834   :  { %1428 = vsyncadd [#allocation4], 4294967264 }
 0x835   :  { %1113 = vsyncpa [#allocation4], 1 }
 0x836   :  { %1114 = vsyncpa [#allocation5], 1 }
 0x837   :  { %1115 = vsyncpa [#allocation7], 1 }

</bundles_post_ra>
